<compile_context>
chip_gen: v6e
topology: v6e:2x2x1
jax: 0.10.0
libtpu: 0.0.40
codegen_flags: <defaults>
</compile_context>

<pallas_src>
import math
import numpy as np
import jax
import jax.numpy as jnp
from jax.experimental import pallas as pl
from jax.experimental.pallas import tpu as pltpu


def _gaussian_1d(scale):
    """1-D gaussian g so that outer(g, g) reproduces AntiAliasInterpolation2d's buffer."""
    sigma = (1.0 / scale - 1.0) / 2.0
    ksize = 2 * round(sigma * 4) + 1
    ka = ksize // 2
    kb = ka - 1 if ksize % 2 == 0 else ka
    mean = (ksize - 1) / 2.0
    g = np.exp(-((np.arange(ksize, dtype=np.float64) - mean) ** 2) / (2.0 * sigma ** 2))
    g = g / g.sum()  # outer(g, g) is then the normalized 2-D kernel
    return g, ka, kb


def _nearest_indices(in_size, out_size, scale):
    # PyTorch F.interpolate(mode='nearest', scale_factor=s): src = floor(dst / s), clipped.
    idx = np.floor(np.arange(out_size) / scale).astype(np.int64)
    return np.minimum(idx, in_size - 1)


def _band_matrix(size, out_idx, g, ka):
    """Rows (selected at out_idx) of the 1-D blur matrix with implicit zero padding."""
    ksize = g.shape[0]
    A = np.zeros((size, size), np.float64)
    for i in range(ksize):
        for r in range(size):
            c = r + i - ka
            if 0 <= c < size:
                A[r, c] += g[i]
    return A[out_idx].astype(np.float32)  # (out_size, size)


def _choose_tb(num_planes, h, w, ho, wo, bytes_per_el=4,
               budget_bytes=8 * 1024 * 1024, max_unroll=8):
    """Planes per grid step: fill VMEM (conservatively, fits v5e/v7x scoped defaults with
    double buffering), bound the in-kernel unroll, and keep >= 2 grid steps for v7x's 2 TCs."""
    per_plane = 2 * (h * w + ho * wo) * bytes_per_el + ho * w * bytes_per_el
    cap = max(1, budget_bytes // max(per_plane, 1))
    cap = min(cap, max_unroll, num_planes)
    if num_planes >= 2:
        cap = min(cap, max(1, num_planes // 2))
    tb = 1
    for d in range(1, cap + 1):
        if num_planes % d == 0:
            tb = d
    return tb


def anti_alias_downsample(x, scale):
    """Fused band-limited downsampling: Y[n, c] = Rh @ X[n, c] @ Rw^T in one Pallas kernel."""
    if scale == 1.0:
        return x
    N, C, H, W = x.shape
    g, ka, _ = _gaussian_1d(scale)
    Ho = int(math.floor(H * scale))
    Wo = int(math.floor(W * scale))
    hidx = _nearest_indices(H, Ho, scale)
    widx = _nearest_indices(W, Wo, scale)

    rh = jnp.asarray(_band_matrix(H, hidx, g, ka))        # (Ho, H): pad + vert blur + row select
    rwT = jnp.asarray(_band_matrix(W, widx, g, ka).T)     # (W, Wo): pad + horiz blur + col select

    planes = N * C
    TB = _choose_tb(planes, H, W, Ho, Wo, bytes_per_el=max(int(x.dtype.itemsize), 4))
    xr = x.reshape(planes, H, W)                          # metadata-only reshape, no pad/cast pass

    def kernel(rh_ref, rwT_ref, x_ref, o_ref):
        rh_v = rh_ref[...]                                # (Ho, H)
        rwT_v = rwT_ref[...]                              # (W, Wo)
        for b in range(TB):                               # small, fully unrolled
            xb = x_ref[b].astype(jnp.float32)             # (H, W)
            t = jnp.dot(rh_v, xb,                          # vertical pass  -> (Ho, W)
                        preferred_element_type=jnp.float32,
                        precision=jax.lax.Precision.HIGHEST)
            yb = jnp.dot(t, rwT_v,                         # horizontal pass -> (Ho, Wo)
                         preferred_element_type=jnp.float32,
                         precision=jax.lax.Precision.HIGHEST)
            o_ref[b] = yb.astype(o_ref.dtype)

    # TODO(synk): for very small Wo (< 128 lanes) the output store is masked; packing several
    # planes' rows into a lane-dense slab would help further but complicates the wrapper layout.
    out = pl.pallas_call(
        kernel,
        out_shape=jax.ShapeDtypeStruct((planes, Ho, Wo), x.dtype),
        grid=(planes // TB,),
        in_specs=[
            pl.BlockSpec((Ho, H), lambda i: (0, 0)),       # Rh (tiny, constant per step)
            pl.BlockSpec((W, Wo), lambda i: (0, 0)),       # Rw^T
            pl.BlockSpec((TB, H, W), lambda i: (i, 0, 0)),
        ],
        out_specs=pl.BlockSpec((TB, Ho, Wo), lambda i: (i, 0, 0)),
        compiler_params=pltpu.CompilerParams(dimension_semantics=("parallel",)),
    )(rh, rwT, xr)

    return out.reshape(N, C, Ho, Wo)


class ImagePyramide:
    """JAX/Pallas port of ImagePyramide (Sec 3.3 pyramide perceptual loss inputs)."""

    def __init__(self, scales, num_channels):
        self.scales = list(scales)
        self.num_channels = num_channels

    def __call__(self, x):
        out_dict = {}
        for scale in self.scales:
            key = 'prediction_' + str(scale)
            if scale == 1.0:
                out_dict[key] = x          # AntiAliasInterpolation2d returns input for scale==1.0
            else:
                out_dict[key] = anti_alias_downsample(x, scale)
        return out_dict


def _reference_downsample(x, scale):
    """Pure-JAX reference (grouped conv via lax) used only for sanity checking."""
    N, C, H, W = x.shape
    g, ka, kb = _gaussian_1d(scale)
    k2d = np.outer(g, g).astype(np.float32)
    w = jnp.broadcast_to(jnp.asarray(k2d)[None, None], (C, 1, k2d.shape[0], k2d.shape[1]))
    out = jax.lax.conv_general_dilated(
        x.astype(jnp.float32), w.astype(jnp.float32),
        window_strides=(1, 1), padding=[(ka, kb), (ka, kb)],
        feature_group_count=C,
        dimension_numbers=('NCHW', 'OIHW', 'NCHW'),
        precision=jax.lax.Precision.HIGHEST)
    Ho = int(math.floor(H * scale))
    Wo = int(math.floor(W * scale))
    hidx = _nearest_indices(H, Ho, scale)
    widx = _nearest_indices(W, Wo, scale)
    return out[:, :, hidx][:, :, :, widx].astype(x.dtype)


if __name__ == "__main__":
    key = jax.random.PRNGKey(0)
    N, C, H, W = 2, 4, 16, 16
    x = jax.random.normal(key, (N, C, H, W), dtype=jnp.float32)

    scales = [1.0, 0.5, 0.25]
    pyramide = ImagePyramide(scales, num_channels=C)

    out = pyramide(x)
    for v in out.values():
        jax.block_until_ready(v)

    ok = bool(jnp.allclose(out['prediction_1.0'], x))
    for s in (0.5, 0.25):
        ref = _reference_downsample(x, s)
        got = out['prediction_' + str(s)]
        assert got.shape == (N, C, int(H * s), int(W * s)), got.shape
        ok &= bool(jnp.allclose(got, ref, atol=1e-4, rtol=1e-4))

    print("KERNEL_OK" if ok else "MISMATCH")
</pallas_src>

<mosaic_0001>
module attributes {stable_mosaic.version = 11 : i64} {
  func.func @kernel(%arg0: i32, %arg1: memref<8x16xf32, #tpu.memory_space<vmem>>, %arg2: memref<16x8xf32, #tpu.memory_space<vmem>>, %arg3: memref<4x16x16xf32, #tpu.memory_space<vmem>>, %arg4: memref<4x8x8xf32, #tpu.memory_space<vmem>>) attributes {dimension_semantics = [#tpu.dimension_semantics<parallel>], iteration_bounds = array<i64: 2>, scalar_prefetch = 0 : i64, scratch_operands = 0 : i64, tpu.core_type = #tpu.core_type<tc>, window_params = [{pipeline_mode = #tpu.pipeline_mode<synchronous>, transform_indices = @transform_0, window_bounds = array<i64: 8, 16>}, {pipeline_mode = #tpu.pipeline_mode<synchronous>, transform_indices = @transform_1, window_bounds = array<i64: 16, 8>}, {transform_indices = @transform_2, window_bounds = array<i64: 4, 16, 16>}, {transform_indices = @transform_3, window_bounds = array<i64: 4, 8, 8>}]} {
    %c0 = arith.constant 0 : index
    %c0_0 = arith.constant 0 : index
    %0 = vector.load %arg1[%c0, %c0_0] : memref<8x16xf32, #tpu.memory_space<vmem>>, vector<8x16xf32>
    %c0_1 = arith.constant 0 : index
    %c0_2 = arith.constant 0 : index
    %1 = vector.load %arg2[%c0_1, %c0_2] : memref<16x8xf32, #tpu.memory_space<vmem>>, vector<16x8xf32>
    %c0_3 = arith.constant 0 : index
    %c0_4 = arith.constant 0 : index
    %c0_5 = arith.constant 0 : index
    %2 = vector.load %arg3[%c0_3, %c0_4, %c0_5] : memref<4x16x16xf32, #tpu.memory_space<vmem>>, vector<1x16x16xf32>
    %3 = vector.shape_cast %2 : vector<1x16x16xf32> to vector<16x16xf32>
    %cst = arith.constant dense<0.000000e+00> : vector<8x16xf32>
    %4 = tpu.matmul %0, %3, %cst {dimension_numbers = #tpu.dot_dimension_numbers<[1], [0], [0], [1], [0, 0, 1, 1], [], []>, precision = #tpu.contract_precision<fp32>} : vector<8x16xf32>, vector<16x16xf32>, vector<8x16xf32> -> vector<8x16xf32>
    %cst_6 = arith.constant dense<0.000000e+00> : vector<8x8xf32>
    %5 = tpu.matmul %4, %1, %cst_6 {dimension_numbers = #tpu.dot_dimension_numbers<[1], [0], [0], [1], [0, 0, 1, 1], [], []>, precision = #tpu.contract_precision<fp32>} : vector<8x16xf32>, vector<16x8xf32>, vector<8x8xf32> -> vector<8x8xf32>
    %c0_7 = arith.constant 0 : index
    %c0_8 = arith.constant 0 : index
    %c0_9 = arith.constant 0 : index
    %6 = vector.load %arg4[%c0_7, %c0_8, %c0_9] : memref<4x8x8xf32, #tpu.memory_space<vmem>>, vector<1x8x8xf32>
    %7 = vector.shape_cast %6 : vector<1x8x8xf32> to vector<8x8xf32>
    %8 = vector.shape_cast %5 : vector<8x8xf32> to vector<1x8x8xf32>
    tpu.vector_store %arg4[%c0_7, %c0_8, %c0_9], %8 {strides = array<i32>} : memref<4x8x8xf32, #tpu.memory_space<vmem>>, vector<1x8x8xf32>,
    %c1 = arith.constant 1 : index
    %c0_10 = arith.constant 0 : index
    %c0_11 = arith.constant 0 : index
    %9 = vector.load %arg3[%c1, %c0_10, %c0_11] : memref<4x16x16xf32, #tpu.memory_space<vmem>>, vector<1x16x16xf32>
    %10 = vector.shape_cast %9 : vector<1x16x16xf32> to vector<16x16xf32>
    %cst_12 = arith.constant dense<0.000000e+00> : vector<8x16xf32>
    %11 = tpu.matmul %0, %10, %cst_12 {dimension_numbers = #tpu.dot_dimension_numbers<[1], [0], [0], [1], [0, 0, 1, 1], [], []>, precision = #tpu.contract_precision<fp32>} : vector<8x16xf32>, vector<16x16xf32>, vector<8x16xf32> -> vector<8x16xf32>
    %cst_13 = arith.constant dense<0.000000e+00> : vector<8x8xf32>
    %12 = tpu.matmul %11, %1, %cst_13 {dimension_numbers = #tpu.dot_dimension_numbers<[1], [0], [0], [1], [0, 0, 1, 1], [], []>, precision = #tpu.contract_precision<fp32>} : vector<8x16xf32>, vector<16x8xf32>, vector<8x8xf32> -> vector<8x8xf32>
    %c1_14 = arith.constant 1 : index
    %c0_15 = arith.constant 0 : index
    %c0_16 = arith.constant 0 : index
    %13 = vector.load %arg4[%c1_14, %c0_15, %c0_16] : memref<4x8x8xf32, #tpu.memory_space<vmem>>, vector<1x8x8xf32>
    %14 = vector.shape_cast %13 : vector<1x8x8xf32> to vector<8x8xf32>
    %15 = vector.shape_cast %12 : vector<8x8xf32> to vector<1x8x8xf32>
    tpu.vector_store %arg4[%c1_14, %c0_15, %c0_16], %15 {strides = array<i32>} : memref<4x8x8xf32, #tpu.memory_space<vmem>>, vector<1x8x8xf32>,
    %c2 = arith.constant 2 : index
    %c0_17 = arith.constant 0 : index
    %c0_18 = arith.constant 0 : index
    %16 = vector.load %arg3[%c2, %c0_17, %c0_18] : memref<4x16x16xf32, #tpu.memory_space<vmem>>, vector<1x16x16xf32>
    %17 = vector.shape_cast %16 : vector<1x16x16xf32> to vector<16x16xf32>
    %cst_19 = arith.constant dense<0.000000e+00> : vector<8x16xf32>
    %18 = tpu.matmul %0, %17, %cst_19 {dimension_numbers = #tpu.dot_dimension_numbers<[1], [0], [0], [1], [0, 0, 1, 1], [], []>, precision = #tpu.contract_precision<fp32>} : vector<8x16xf32>, vector<16x16xf32>, vector<8x16xf32> -> vector<8x16xf32>
    %cst_20 = arith.constant dense<0.000000e+00> : vector<8x8xf32>
    %19 = tpu.matmul %18, %1, %cst_20 {dimension_numbers = #tpu.dot_dimension_numbers<[1], [0], [0], [1], [0, 0, 1, 1], [], []>, precision = #tpu.contract_precision<fp32>} : vector<8x16xf32>, vector<16x8xf32>, vector<8x8xf32> -> vector<8x8xf32>
    %c2_21 = arith.constant 2 : index
    %c0_22 = arith.constant 0 : index
    %c0_23 = arith.constant 0 : index
    %20 = vector.load %arg4[%c2_21, %c0_22, %c0_23] : memref<4x8x8xf32, #tpu.memory_space<vmem>>, vector<1x8x8xf32>
    %21 = vector.shape_cast %20 : vector<1x8x8xf32> to vector<8x8xf32>
    %22 = vector.shape_cast %19 : vector<8x8xf32> to vector<1x8x8xf32>
    tpu.vector_store %arg4[%c2_21, %c0_22, %c0_23], %22 {strides = array<i32>} : memref<4x8x8xf32, #tpu.memory_space<vmem>>, vector<1x8x8xf32>,
    %c3 = arith.constant 3 : index
    %c0_24 = arith.constant 0 : index
    %c0_25 = arith.constant 0 : index
    %23 = vector.load %arg3[%c3, %c0_24, %c0_25] : memref<4x16x16xf32, #tpu.memory_space<vmem>>, vector<1x16x16xf32>
    %24 = vector.shape_cast %23 : vector<1x16x16xf32> to vector<16x16xf32>
    %cst_26 = arith.constant dense<0.000000e+00> : vector<8x16xf32>
    %25 = tpu.matmul %0, %24, %cst_26 {dimension_numbers = #tpu.dot_dimension_numbers<[1], [0], [0], [1], [0, 0, 1, 1], [], []>, precision = #tpu.contract_precision<fp32>} : vector<8x16xf32>, vector<16x16xf32>, vector<8x16xf32> -> vector<8x16xf32>
    %cst_27 = arith.constant dense<0.000000e+00> : vector<8x8xf32>
    %26 = tpu.matmul %25, %1, %cst_27 {dimension_numbers = #tpu.dot_dimension_numbers<[1], [0], [0], [1], [0, 0, 1, 1], [], []>, precision = #tpu.contract_precision<fp32>} : vector<8x16xf32>, vector<16x8xf32>, vector<8x8xf32> -> vector<8x8xf32>
    %c3_28 = arith.constant 3 : index
    %c0_29 = arith.constant 0 : index
    %c0_30 = arith.constant 0 : index
    %27 = vector.load %arg4[%c3_28, %c0_29, %c0_30] : memref<4x8x8xf32, #tpu.memory_space<vmem>>, vector<1x8x8xf32>
    %28 = vector.shape_cast %27 : vector<1x8x8xf32> to vector<8x8xf32>
    %29 = vector.shape_cast %26 : vector<8x8xf32> to vector<1x8x8xf32>
    tpu.vector_store %arg4[%c3_28, %c0_29, %c0_30], %29 {strides = array<i32>} : memref<4x8x8xf32, #tpu.memory_space<vmem>>, vector<1x8x8xf32>,
    return
  }
  func.func @transform_0(%arg0: i32) -> (i32, i32) {
    %c0_i32 = arith.constant 0 : i32
    %c0_i32_0 = arith.constant 0 : i32
    %c0_i32_1 = arith.constant 0 : i32
    return %c0_i32, %c0_i32_0 : i32, i32
  }
  func.func @transform_1(%arg0: i32) -> (i32, i32) {
    %c0_i32 = arith.constant 0 : i32
    %c0_i32_0 = arith.constant 0 : i32
    %c0_i32_1 = arith.constant 0 : i32
    return %c0_i32, %c0_i32_0 : i32, i32
  }
  func.func @transform_2(%arg0: i32) -> (i32, i32, i32) {
    %c0_i32 = arith.constant 0 : i32
    %c0_i32_0 = arith.constant 0 : i32
    %c0_i32_1 = arith.constant 0 : i32
    return %arg0, %c0_i32, %c0_i32_0 : i32, i32, i32
  }
  func.func @transform_3(%arg0: i32) -> (i32, i32, i32) {
    %c0_i32 = arith.constant 0 : i32
    %c0_i32_0 = arith.constant 0 : i32
    %c0_i32_1 = arith.constant 0 : i32
    return %arg0, %c0_i32, %c0_i32_0 : i32, i32, i32
  }
}

</mosaic_0001>

<bundles_post_ra>
// kernel: tpu_custom_call.1
= control target key start
LH: loop header
LB: loop body
LE: loop exit
PB: predicated region body
PF: predicated region fallthrough
CT: control target
= control target key end

     0   :  { %8 = vsyncpa [#allocation3], 0  ;;  %s5226_s0 = inlined_call_operand.vmem [shape: f32[8,16], index: 0, kind: input, shape index: {}]   ;;  %s5227_s1 = inlined_call_operand.vmem [shape: f32[16,8], index: 1, kind: input, shape index: {}]   ;;  %s5228_s2 = inlined_call_operand.hbm [shape: f32[8,16,16], index: 2, kind: input, shape index: {}]   ;;  %s5229_s3 = inlined_call_operand.hbm [shape: f32[8,8,8], index: 3, kind: output, shape index: {}]  }
   0x1   :  { %10 = vsyncpa [#allocation3 + $0x1], 0 }
   0x2   :  { %11 = vsyncpa [#allocation4], 0 }
   0x3   :  { %13 = vsyncpa [#allocation4 + $0x1], 0  ;;  %s4670_s12 = smov 0   ;;  %s4672_s13 = smov 0  }
   0x4   :  { %s4674_s14 = smov 0   ;;  %s4676_s15 = smov 0  }
   0x5 LB: > { %s4691_s16 = sadd.s32 4294967295, %s4640_s15   ;;  %s3989_s17 = sadd.s32 4294967294, %s4640_s15   ;;  %s4640_s15 = sphi %s4676_s15, %s5244_s15   ;;  %s4636_s14 = sphi %s4674_s14, %s5243_s14   ;;  %s4632_s13 = sphi %s4672_s13, %s5242_s13   ;;  %s4628_s12 = sphi %s4670_s12, %s5241_s12  }
   0x6   : > { %s4695_s18 = sadd.s32 1, %s4640_s15   ;;  %s68_s19 = sadd.s32 1, %s4636_s14 }
   0x7   : > { %s65_s20 = ssub.s32 %s4640_s15, %s4695_s18  ;;  %p75_p0 = scmp.ne.s32.totalorder %s4636_s14, %s4632_s13 }
   0x8   : > { %p66_p1 = scmp.eq.s32.totalorder %s65_s20, 0  ;;  %p76_p2 = scmp.eq.s32.totalorder %s4640_s15, 0 }
   0x9   : > { %p81_p3 = scmp.ne.s32.totalorder %s4632_s13, %s4628_s12  ;;  %p82_p4 = scmp.eq.s32.totalorder %s4691_s16, 0 }
   0xa   : > { %s4707_s21 = scalar_select %p66_p1, %s4636_s14, %s68_s19  }
   0xb   : > { %p4709_p5 = por %p76_p2, %p75_p0  ;;  %p4713_p6 = por %p82_p4, %p81_p3 }
   0xc   : > { %p105_p7 = scmp.eq.s32.totalorder %s4691_s16, 1  ;;  %p111_p8 = scmp.eq.s32.totalorder %s3989_s17, 1 }
   0xd   : > { %s5233_s23 = scalar_select %p4713_p6, 1, 0 }
   0xe   : > { %p4508_p10 = scmp.lt.s32.totalorder %s4640_s15, 2  ;;  %p4720_p11 = por %p105_p7, %p75_p0 }
   0xf   : > { %p4724_p12 = por %p111_p8, %p81_p3  ;;  %s137_s26 = sand.u32 1, %s4636_s14  }
  0x10   : > { %s5234_s24 = scalar_select %p4720_p11, 1, 0 }
  0x11   : > { %s5235_s25 = scalar_select %p4724_p12, 1, 0 }
  0x12   : > { %s4014_s27 = sshll.u32 %s4640_s15, 10  ;;  %s3992_s28 = sshll.u32 %s137_s26, 6 }
  0x13   : > { %s4733_s4 = scalar_lea.hbm %s5228_s2, %s4014_s27  ;;  %s141_s5 = scalar_lea.vmem [#allocation2], %s3992_s28 }
  0x14   : > { %s149_s6 = sshll.u32 %s141_s5, 4  ;;  %p4737_p13 = pnand %p4508_p10, %p4709_p5  ;;  %s4741_s6 = int_to_ptr.vmem [resolvable:$true] %s149_s6 }
  0x15   : > { %s4743_s8 = scalar_lea.sflag [#allocation3], %s137_s26  ;;  %s4548_s9 = scalar_lea.hbm %s4733_s4, 1024 }
  0x16   : > { %p4549_p0 = scmp.ne.s32.totalorder %s4733_s4, %s4548_s9  ;;  %p4550_p1 = pneg %p4737_p13 }
  0x17   : > { %s4553_s17 = scalar_lea.hbm %s5228_s2, 2048  ;;  %p4554_p4 = scmp.lt.s32.totalorder %s4733_s4, %s5228_s2 }
  0x18   : > { %p4551_p2 = pnand %p4550_p1, %p4549_p0  ;;  %p4555_p5 = scmp.lt.s32.totalorder %s4553_s17, %s4548_s9 }
  0x1a   : > { %p4552_p3 = pneg %p4551_p2  ;;  %p4556_p7 = por %p4555_p5, %p4554_p4 }
  0x1c   : > { %p4557_p8 = pnand %p4556_p7, %p4552_p3 }
  0x1e   : > { %4560 = shalt.err (!%p4557_p8)
}
  0x1f   : > { %s4561_s22 = scalar_lea.vmem %s4741_s6, 1024  ;;  %s4642_s26 = smov [#allocation2]  }
  0x20   : > { %p4562_p10 = scmp.ne.s32.totalorder %s4741_s6, %s4561_s22  ;;  %s4566_s27 = sshll.u32 %s4642_s26, 4  ;;  %s4567_s27 = int_to_ptr.vmem [resolvable:$false] %s4566_s27 }
  0x21   : > { %s4568_s28 = scalar_lea.vmem %s4567_s27, 2048  ;;  %p4569_p2 = scmp.lt.s32.totalorder %s4741_s6, %s4567_s27 }
  0x22   : > { %p4564_p9 = pnand %p4562_p10, %p4550_p1  ;;  %p4570_p12 = scmp.lt.s32.totalorder %s4568_s28, %s4561_s22 }
  0x24   : > { %p4565_p0 = pneg %p4564_p9  ;;  %p4571_p11 = por %p4570_p12, %p4569_p2 }
  0x26   : > { %p4572_p6 = pnand %p4571_p11, %p4565_p0 }
  0x28   : > { %4575 = shalt.err (!%p4572_p6)
}
  0x29   : > { %s4643_s29 = smov 128   ;;  %s4644_s30 = smov 8  }
  0x2a   : > { %4503 = dma.hbm_to_vmem [thread:$0]  (!%p4737_p13), %s4733_s4, 1024, %s4741_s6, %s4743_s8, %s4643_s29, %s4643_s29, %s4644_s30  }
  0x2b   : > { %p3996_p9 = scmp.ge.s32.totalorder %s4640_s15, 1  ;;  %p157_p1 = scmp.lt.s32.totalorder %s4640_s15, 3 }
  0x2d   : > { %p158_p3 = pnand %p3996_p9, %p157_p1 }
  0x2e   : > { %s4767_s5 = sand.u32 (!%p158_p3), 1, %s4632_s13   ;;  %p5237_p6 = scmp.ne.s32.totalorder (!%p158_p3), %s5233_s23, 0 }
  0x2f   : > { %161 = sbr.rel (%p158_p3) target bundleno = 1194 (0x4aa), region = 32  ;;  %s3997_s9 = sshll.u32 (!%p158_p3), %s4767_s5, 6 }
  0x30   : > { %s164_s10 = scalar_lea.sflag (!%p158_p3), [#allocation3], %s4767_s5  ;;  %s4771_s11 = scalar_lea.vmem (!%p158_p3), [#allocation2], %s3997_s9 }
  0x34   : > { %4619 = dma.done.wait (%p5237_p6), %s164_s10, 1024  }
  0x35   : > { %4621 = vsyncadd (%p5237_p6), %s164_s10, 4294966272  ;;  %v4645_v0 = vmov 0.0   ;;  %vm4646_vm0 = vmmov 0   ;;  %vm197_vm1 = vcmask 130048   ;;  %v196_v1 = vld [vmem:[%s4771_s11 + $0x8] sm:$0xff]  ;;  %v195_v2 = vld [vmem:[%s4771_s11] sm:$0xff] }
  0x36   : > { %4160 = vmatprep.subr.mxu0 %v4645_v0  ;;  %4167 = vmatprep.subr.mxu1 %v4645_v0  ;;  %v192_v3 = vld [vmem:[%s5226_s0] sm:$0xff]  ;;  %v230_v4 = vand.u32 4294901760, %v196_v1  ;;  %v233_v5 = vand.u32 4294901760, %v195_v2  ;;  %v194_v20 = vld [vmem:[%s5227_s1 + $0x8] sm:$0xff]  ;;  %v4000_v40 = vld [vmem:[%s4771_s11 + $0x18] sm:$0xff]  ;;  %s3998_s19 = sshll.u32 %s4767_s5, 5 }
  0x37   : > { %4164 = vmatprep.mubr.msk.f32.mxu0 %vm4646_vm0, %v4645_v0  ;;  %4171 = vmatprep.mubr.msk.f32.mxu1 %vm4646_vm0, %v4645_v0  ;;  %v199_v6 = vsel %vm197_vm1, %v192_v3, 0  ;;  %v4834_v21 = vand.u32 4294901760, %v194_v20  ;;  %v193_v22 = vld [vmem:[%s5227_s1] sm:$0xff]  ;;  %v4870_v44 = vand.u32 4294901760, %v4000_v40  ;;  %v3999_v46 = vld [vmem:[%s4771_s11 + $0x10] sm:$0xff]  ;;  %vm1122_vm2 = vcmask 64512  }
  0x38   : > { %v4789_v7 = vand.u32 4294901760, %v199_v6  ;;  %4161 = vmatpush3.msra.mxu0 %v230_v4  ;;  %v308_v8 = vsub.f32 %v196_v1, %v230_v4  ;;  %v315_v9 = vsub.f32 %v195_v2, %v233_v5  ;;  %v4842_v24 = vand.u32 4294901760, %v193_v22  ;;  %s4961_s20 = scalar_lea.vmem [#allocation5], %s3998_s19  ;;  %s4015_s26 = sshll.u32 %s4691_s16, 9 }
  0x39   : > { %4162 = vmatprep.subr.mxu0 %v4645_v0  ;;  %v4840_v23 = vsub.f32 %v194_v20, %v4834_v21  ;;  %v4874_v51 = vsub.f32 %v4000_v40, %v4870_v44  ;;  %v4876_v52 = vand.u32 4294901760, %v3999_v46  ;;  %s3916_s22 = sshll.u32 %s4961_s20, 4  ;;  %s5181_s29 = scalar_lea.hbm %s5229_s3, %s4015_s26  ;;  %s5176_s22 = int_to_ptr.vmem [resolvable:$true] %s3916_s22 }
  0x3a   : > { %v4793_v10 = vsub.f32 %v199_v6, %v4789_v7  ;;  %4163 = vmatpush3.msra.mxu0 %v233_v5  ;;  %v309_v11 = vand.u32 4294901760, %v308_v8  ;;  %v316_v12 = vand.u32 4294901760, %v315_v9  ;;  %v4850_v26 = vsub.f32 %v193_v22, %v4842_v24  ;;  %s3903_s30 = scalar_lea.sflag [#allocation4], %s4767_s5  ;;  %s4576_s9 = scalar_lea.vmem %s5176_s22, 512 }
  0x3b   : > { %4174 = vmatprep.subr.mxu0 %v4645_v0  ;;  %v4847_v25 = vand.u32 4294901760, %v4840_v23  ;;  %v1235_v56 = vand.u32 4294901760, %v4874_v51  ;;  %v4881_v57 = vsub.f32 %v3999_v46, %v4876_v52  ;;  %p4577_p11 = scmp.ne.s32.totalorder %s5176_s22, %s4576_s9  ;;  %p5238_p12 = scmp.ne.s32.totalorder %s5234_s24, 0 }
  0x3c   : > { %v4796_v13 = vand.u32 4294901760, %v4793_v10  ;;  %v310_v14 = vsub.f32 %v308_v8, %v309_v11  ;;  %v317_v15 = vsub.f32 %v315_v9, %v316_v12  ;;  %v4857_v28 = vand.u32 4294901760, %v4850_v26  ;;  %s4647_s16 = smov [#allocation5]  }
  0x3d   : > { %v772_v27 = vsub.f32 %v4840_v23, %v4847_v25  ;;  %v1236_v60 = vsub.f32 %v4874_v51, %v1235_v56  ;;  %v1242_v61 = vand.u32 4294901760, %v4881_v57  ;;  %p4578_p13 = pnand %p4577_p11, %p5238_p12  ;;  %s4580_s10 = sshll.u32 %s4647_s16, 4  ;;  %s4581_s10 = int_to_ptr.vmem [resolvable:$false] %s4580_s10 }
  0x3e   : > { %v271_v16 = vsub.f32 %v4793_v10, %v4796_v13  ;;  %v311_v17 = vand.u32 4294901760, %v310_v14  ;;  %v318_v18 = vand.u32 4294901760, %v317_v15  ;;  %v779_v30 = vsub.f32 %v4850_v26, %v4857_v28  ;;  %p4583_p5 = scmp.lt.s32.totalorder %s5176_s22, %s4581_s10 }
  0x3f   : > { %v4859_v29 = vand.u32 4294901760, %v772_v27  ;;  %v1237_v1 = vand.u32 4294901760, %v1236_v60  ;;  %v1243_v2 = vsub.f32 %v4881_v57, %v1242_v61  ;;  %p4579_p4 = pneg %p4578_p13 }
  0x40   : > { %v4801_v19 = vand.u32 4294901760, %v271_v16  ;;  %4168 = vmatpush3.msra.mxu1 %v311_v17  ;;  %v4864_v31 = vand.u32 4294901760, %v779_v30 }
  0x41   : > { %4169 = vmatprep.subr.mxu1 %v4645_v0  ;;  %v1244_v3 = vand.u32 4294901760, %v1243_v2 }
  0x42   : > { %4165 = vmatmul.mubr.f32.vlgmr.msra.gmra.mxu0 %v4801_v19  ;;  %4170 = vmatpush3.msra.mxu1 %v318_v18 }
  0x43   : > { %4175 = vmatpush3.msra.mxu0 %v308_v8  ;;  %4172 = vmatmul.mubr.f32.vlgmr.msra.gmra.mxu1 %v4789_v7 }
  0x44   : > { %4176 = vmatprep.subr.mxu0 %v4645_v0  ;;  %4181 = vmatprep.subr.mxu1 %v4645_v0 }
  0x45   : > { %4177 = vmatpush3.msra.mxu0 %v315_v9  ;;  %4178 = vmatprep.mubr.msk.f32.mxu0 %vm4646_vm0, %v4645_v0 }
  0x46   : > { %4182 = vmatpush3.msra.mxu1 %v230_v4  ;;  %4179 = vmatmul.mubr.f32.vlgmr.msra.gmra.mxu0 %v4793_v10 }
  0x47   : > { %4183 = vmatprep.subr.mxu1 %v4645_v0  ;;  %4188 = vmatprep.subr.mxu0 %v4645_v0 }
  0x48   : > { %4184 = vmatpush3.msra.mxu1 %v233_v5  ;;  %4185 = vmatprep.mubr.msk.f32.mxu1 %vm4646_vm0, %v4645_v0 }
  0x49   : > { %4189 = vmatpush3.msra.mxu0 %v309_v11  ;;  %4186 = vmatmul.mubr.f32.vlgmr.msra.gmra.mxu1 %v4796_v13 }
  0x4a   : > { %4190 = vmatprep.subr.mxu0 %v4645_v0  ;;  %4195 = vmatprep.subr.mxu1 %v4645_v0 }
  0x4b   : > { %4191 = vmatpush3.msra.mxu0 %v316_v12  ;;  %4192 = vmatprep.mubr.msk.f32.mxu0 %vm4646_vm0, %v4645_v0 }
  0x4c   : > { %4196 = vmatpush3.msra.mxu1 %v230_v4  ;;  %4193 = vmatmul.mubr.f32.vlgmr.msra.gmra.mxu0 %v4789_v7 }
  0x4d   : > { %4197 = vmatprep.subr.mxu1 %v4645_v0  ;;  %4199 = vmatprep.mubr.msk.f32.mxu1 %vm4646_vm0, %v4645_v0 }
  0x4e   : > { %4198 = vmatpush3.msra.mxu1 %v233_v5  ;;  %4202 = vmatprep.subr.mxu0 %v4645_v0 }
  0x4f   : > { %4200 = vmatmul.mubr.f32.vlgmr.msra.gmra.mxu1 %v4789_v7  ;;  %4209 = vmatprep.subr.mxu1 %v4645_v0 }
  0x50   : > { %4213 = vmatprep.mubr.msk.f32.mxu1 %vm4646_vm0, %v4645_v0  ;;  %4206 = vmatprep.mubr.msk.f32.mxu0 %vm4646_vm0, %v4645_v0 }
  0x51   : > { %4203 = vmatpush3.msra.mxu0 %v4834_v21  ;;  %4210 = vmatpush3.msra.mxu1 %v4859_v29 }
  0x52   : > { %4204 = vmatprep.subr.mxu0 %v4645_v0  ;;  %4211 = vmatprep.subr.mxu1 %v4645_v0 }
  0x53   : > { %4205 = vmatpush3.msra.mxu0 %v4842_v24  ;;  %4212 = vmatpush3.msra.mxu1 %v4864_v31 }
  0x54   : > { %4216 = vmatprep.subr.mxu0 %v4645_v0  ;;  %4223 = vmatprep.subr.mxu1 %v4645_v0 }
 0x102   : > { %v274_v32 = vpop.f32.mrf.mxu0 }
 0x103   : > { %v355_v34 = vpop.f32.mrf.mxu1 }
 0x104   : > { %v4166_v33 = vpop.f32.mrf.mxu0  ;;  %v356_v35 = vadd.f32 %v355_v34, %v274_v32 }
 0x105   : > { %v4173_v36 = vpop.f32.mrf.mxu1 }
 0x106   : > { %v431_v37 = vpop.f32.mrf.mxu0 }
 0x107   : > { %v432_v38 = vadd.f32 %v431_v37, %v356_v35 }
 0x108   : > { %v4180_v39 = vpop.f32.mrf.mxu0 }
 0x109   : > { %v506_v41 = vpop.f32.mrf.mxu1 }
 0x10a   : > { %v507_v42 = vadd.f32 %v506_v41, %v432_v38 }
 0x10b   : > { %v4187_v43 = vpop.f32.mrf.mxu1 }
 0x10c   : > { %v583_v45 = vpop.f32.mrf.mxu0 }
 0x10d   : > { %v584_v47 = vadd.f32 %v583_v45, %v507_v42  ;;  %v4003_v42 = vld [vmem:[%s4771_s11 + $0x28] sm:$0xff] }
 0x10e   : > { %v4194_v48 = vpop.f32.mrf.mxu0  ;;  %v4966_v45 = vand.u32 4294901760, %v4003_v42 }
 0x10f   : > { %v656_v49 = vpop.f32.mrf.mxu1 }
 0x110   : > { %v657_v50 = vadd.f32 %v656_v49, %v584_v47  ;;  %v4002_v47 = vld [vmem:[%s4771_s11 + $0x20] sm:$0xff] }
 0x111   : > { %v4201_v53 = vpop.f32.mrf.mxu1 }
 0x112   : > { %v661_v54 = vsel %vm197_vm1, %v657_v50, 0  ;;  %v4972_v53 = vand.u32 4294901760, %v4002_v47 }
 0x113   : > { %v730_v55 = vand.u32 4294901760, %v661_v54 }
 0x115   : > { %v731_v58 = vsub.f32 %v661_v54, %v730_v55  ;;  %4214 = vmatmul.mubr.f32.vlgmr.msra.gmra.mxu1 %v730_v55 }
 0x116   : > { %4224 = vmatpush3.msra.mxu1 %v4834_v21  ;;  %4227 = vmatprep.mubr.msk.f32.mxu1 %vm4646_vm0, %v4645_v0 }
 0x117   : > { %4225 = vmatprep.subr.mxu1 %v4645_v0  ;;  %v732_v59 = vand.u32 4294901760, %v731_v58 }
 0x118   : > { %4226 = vmatpush3.msra.mxu1 %v4842_v24 }
 0x119   : > { %4228 = vmatmul.mubr.f32.vlgmr.msra.gmra.mxu1 %v732_v59  ;;  %4237 = vmatprep.subr.mxu1 %v4645_v0  ;;  %v733_v62 = vsub.f32 %v731_v58, %v732_v59 }
 0x11a   : > { %4238 = vmatpush3.msra.mxu1 %v4834_v21  ;;  %4241 = vmatprep.mubr.msk.f32.mxu1 %vm4646_vm0, %v4645_v0 }
 0x11b   : > { %4239 = vmatprep.subr.mxu1 %v4645_v0  ;;  %v734_v63 = vand.u32 4294901760, %v733_v62 }
 0x11c   : > { %4240 = vmatpush3.msra.mxu1 %v4842_v24 }
 0x11d   : > { %4207 = vmatmul.mubr.f32.vlgmr.msra.gmra.mxu0 %v734_v63  ;;  %4242 = vmatmul.mubr.f32.vlgmr.msra.gmra.mxu1 %v730_v55 }
 0x11e   : > { %4217 = vmatpush3.msra.mxu0 %v4840_v23  ;;  %4220 = vmatprep.mubr.msk.f32.mxu0 %vm4646_vm0, %v4645_v0 }
 0x11f   : > { %4218 = vmatprep.subr.mxu0 %v4645_v0  ;;  %4251 = vmatprep.subr.mxu1 %v4645_v0 }
 0x120   : > { %4219 = vmatpush3.msra.mxu0 %v4850_v26  ;;  %4252 = vmatpush3.msra.mxu1 %v1237_v1 }
 0x121   : > { %4221 = vmatmul.mubr.f32.vlgmr.msra.gmra.mxu0 %v731_v58  ;;  %4230 = vmatprep.subr.mxu0 %v4645_v0  ;;  %v4977_v58 = vsub.f32 %v4002_v47, %v4972_v53 }
 0x122   : > { %4231 = vmatpush3.msra.mxu0 %v4847_v25  ;;  %4234 = vmatprep.mubr.msk.f32.mxu0 %vm4646_vm0, %v4645_v0 }
 0x123   : > { %4232 = vmatprep.subr.mxu0 %v4645_v0  ;;  %4253 = vmatprep.subr.mxu1 %v4645_v0  ;;  %v2168_v62 = vand.u32 4294901760, %v4977_v58 }
 0x124   : > { %4233 = vmatpush3.msra.mxu0 %v4857_v28  ;;  %4254 = vmatpush3.msra.mxu1 %v1244_v3 }
 0x125   : > { %4235 = vmatmul.mubr.f32.vlgmr.msra.gmra.mxu0 %v730_v55  ;;  %4244 = vmatprep.subr.mxu0 %v4645_v0  ;;  %v2169_v3 = vsub.f32 %v4977_v58, %v2168_v62 }
 0x126   : > { %4245 = vmatpush3.msra.mxu0 %v4870_v44  ;;  %4248 = vmatprep.mubr.msk.f32.mxu0 %vm4646_vm0, %v4645_v0 }
 0x127   : > { %4246 = vmatprep.subr.mxu0 %v4645_v0  ;;  %4255 = vmatprep.mubr.msk.f32.mxu1 %vm4646_vm0, %v4645_v0 }
 0x128   : > { %4247 = vmatpush3.msra.mxu0 %v4876_v52  ;;  %4256 = vmatmul.mubr.f32.vlgmr.msra.gmra.mxu1 %v4789_v7 }
 0x129   : > { %4249 = vmatmul.mubr.f32.vlgmr.msra.gmra.mxu0 %v4801_v19  ;;  %4258 = vmatprep.subr.mxu0 %v4645_v0 }
 0x12a   : > { %4259 = vmatpush3.msra.mxu0 %v4874_v51  ;;  %4265 = vmatprep.subr.mxu1 %v4645_v0 }
 0x12b   : > { %4260 = vmatprep.subr.mxu0 %v4645_v0  ;;  %4266 = vmatpush3.msra.mxu1 %v4870_v44 }
 0x12c   : > { %4261 = vmatpush3.msra.mxu0 %v4881_v57  ;;  %4262 = vmatprep.mubr.msk.f32.mxu0 %vm4646_vm0, %v4645_v0 }
 0x12d   : > { %4267 = vmatprep.subr.mxu1 %v4645_v0  ;;  %4263 = vmatmul.mubr.f32.vlgmr.msra.gmra.mxu0 %v4793_v10 }
 0x12e   : > { %4268 = vmatpush3.msra.mxu1 %v4876_v52  ;;  %4269 = vmatprep.mubr.msk.f32.mxu1 %vm4646_vm0, %v4645_v0 }
 0x12f   : > { %4272 = vmatprep.subr.mxu0 %v4645_v0  ;;  %4270 = vmatmul.mubr.f32.vlgmr.msra.gmra.mxu1 %v4796_v13 }
 0x130   : > { %4273 = vmatpush3.msra.mxu0 %v1235_v56  ;;  %4279 = vmatprep.subr.mxu1 %v4645_v0 }
 0x131   : > { %4274 = vmatprep.subr.mxu0 %v4645_v0  ;;  %4280 = vmatpush3.msra.mxu1 %v4870_v44 }
 0x132   : > { %4275 = vmatpush3.msra.mxu0 %v1242_v61  ;;  %4276 = vmatprep.mubr.msk.f32.mxu0 %vm4646_vm0, %v4645_v0 }
 0x133   : > { %4281 = vmatprep.subr.mxu1 %v4645_v0  ;;  %4277 = vmatmul.mubr.f32.vlgmr.msra.gmra.mxu0 %v4789_v7 }
 0x134   : > { %4282 = vmatpush3.msra.mxu1 %v4876_v52  ;;  %4283 = vmatprep.mubr.msk.f32.mxu1 %vm4646_vm0, %v4645_v0  ;;  %v4970_v52 = vsub.f32 %v4003_v42, %v4966_v45 }
 0x135   : > { %4284 = vmatmul.mubr.f32.vlgmr.msra.gmra.mxu1 %v4789_v7  ;;  %4293 = vmatprep.subr.mxu1 %v4645_v0 }
 0x136   : > { %4294 = vmatpush3.msra.mxu1 %v4859_v29  ;;  %4297 = vmatprep.mubr.msk.f32.mxu1 %vm4646_vm0, %v4645_v0  ;;  %v2161_v57 = vand.u32 4294901760, %v4970_v52 }
 0x137   : > { %4295 = vmatprep.subr.mxu1 %v4645_v0  ;;  %4286 = vmatprep.subr.mxu0 %v4645_v0 }
 0x138   : > { %4296 = vmatpush3.msra.mxu1 %v4864_v31  ;;  %4287 = vmatpush3.msra.mxu0 %v4834_v21  ;;  %v2162_v61 = vsub.f32 %v4970_v52, %v2161_v57 }
 0x139   : > { %4307 = vmatprep.subr.mxu1 %v4645_v0  ;;  %4288 = vmatprep.subr.mxu0 %v4645_v0 }
 0x13a   : > { %4289 = vmatpush3.msra.mxu0 %v4842_v24  ;;  %4290 = vmatprep.mubr.msk.f32.mxu0 %vm4646_vm0, %v4645_v0  ;;  %v2163_v2 = vand.u32 4294901760, %v2162_v61 }
 0x13b   : > { %4300 = vmatprep.subr.mxu0 %v4645_v0 }
 0x1d5   : > { %v817_v4 = vpop.f32.mrf.mxu1 }
 0x1d7   : > { %v4215_v5 = vpop.f32.mrf.mxu1 }
 0x1d9   : > { %v968_v6 = vpop.f32.mrf.mxu1 }
 0x1db   : > { %v4229_v8 = vpop.f32.mrf.mxu1 }
 0x1dd   : > { %v736_v9 = vpop.f32.mrf.mxu0  ;;  %v1118_v11 = vpop.f32.mrf.mxu1 }
 0x1de   : > { %v818_v15 = vadd.f32 %v817_v4, %v736_v9  ;;  %v2170_v4 = vand.u32 4294901760, %v2169_v3 }
 0x1df   : > { %v4208_v12 = vpop.f32.mrf.mxu0  ;;  %v4243_v14 = vpop.f32.mrf.mxu1 }
 0x1e1   : > { %v893_v16 = vpop.f32.mrf.mxu0 }
 0x1e2   : > { %v894_v17 = vadd.f32 %v893_v16, %v818_v15 }
 0x1e3   : > { %v4222_v18 = vpop.f32.mrf.mxu0 }
 0x1e4   : > { %v969_v20 = vadd.f32 %v968_v6, %v894_v17 }
 0x1e5   : > { %v1045_v22 = vpop.f32.mrf.mxu0 }
 0x1e6   : > { %v1046_v27 = vadd.f32 %v1045_v22, %v969_v20 }
 0x1e7   : > { %v4236_v30 = vpop.f32.mrf.mxu0 }
 0x1e8   : > { %v1119_v32 = vadd.f32 %v1118_v11, %v1046_v27  ;;  %v1281_v33 = vpop.f32.mrf.mxu1 }
 0x1e9   : > { %v1200_v34 = vpop.f32.mrf.mxu0 }
 0x1ea   : > { %1123 = vst.msk [vmem:[%s4961_s20] sm:$0xff] %vm1122_vm2, %v1119_v32  ;;  %v4257_v35 = vpop.f32.mrf.mxu1  ;;  %v1282_v37 = vadd.f32 %v1281_v33, %v1200_v34 }
 0x1eb   : > { %v4250_v36 = vpop.f32.mrf.mxu0 }
 0x1ed   : > { %v1357_v38 = vpop.f32.mrf.mxu0 }
 0x1ee   : > { %v1358_v39 = vadd.f32 %v1357_v38, %v1282_v37 }
 0x1ef   : > { %v1432_v40 = vpop.f32.mrf.mxu1  ;;  %v4264_v41 = vpop.f32.mrf.mxu0 }
 0x1f0   : > { %v1433_v43 = vadd.f32 %v1432_v40, %v1358_v39 }
 0x1f1   : > { %v4271_v44 = vpop.f32.mrf.mxu1 }
 0x1f3   : > { %v1509_v46 = vpop.f32.mrf.mxu0 }
 0x1f4   : > { %v1510_v48 = vadd.f32 %v1509_v46, %v1433_v43  ;;  %v4006_v43 = vld [vmem:[%s4771_s11 + $0x38] sm:$0xff] }
 0x1f5   : > { %v1582_v49 = vpop.f32.mrf.mxu1  ;;  %v4278_v50 = vpop.f32.mrf.mxu0  ;;  %v5059_v46 = vand.u32 4294901760, %v4006_v43 }
 0x1f6   : > { %v1583_v51 = vadd.f32 %v1582_v49, %v1510_v48  ;;  %v4005_v48 = vld [vmem:[%s4771_s11 + $0x30] sm:$0xff]  ;;  %s4582_s11 = scalar_lea.vmem %s4581_s10, 1024 }
 0x1f7   : > { %v4285_v54 = vpop.f32.mrf.mxu1  ;;  %p4584_p7 = scmp.lt.s32.totalorder %s4582_s11, %s4576_s9 }
 0x1f8   : > { %v1587_v55 = vsel %vm197_vm1, %v1583_v51, 0  ;;  %v5065_v54 = vand.u32 4294901760, %v4005_v48 }
 0x1f9   : > { %v1656_v56 = vand.u32 4294901760, %v1587_v55  ;;  %p4585_p8 = por %p4584_p7, %p4583_p5 }
 0x1fb   : > { %v1657_v59 = vsub.f32 %v1587_v55, %v1656_v56  ;;  %4298 = vmatmul.mubr.f32.vlgmr.msra.gmra.mxu1 %v1656_v56  ;;  %p4586_p10 = pnand %p4585_p8, %p4579_p4 }
 0x1fc   : > { %4308 = vmatpush3.msra.mxu1 %v4834_v21  ;;  %4311 = vmatprep.mubr.msk.f32.mxu1 %vm4646_vm0, %v4645_v0 }
 0x1fd   : > { %4309 = vmatprep.subr.mxu1 %v4645_v0  ;;  %v1658_v60 = vand.u32 4294901760, %v1657_v59 }
 0x1fe   : > { %4310 = vmatpush3.msra.mxu1 %v4842_v24 }
 0x1ff   : > { %4312 = vmatmul.mubr.f32.vlgmr.msra.gmra.mxu1 %v1658_v60  ;;  %4321 = vmatprep.subr.mxu1 %v4645_v0  ;;  %v1659_v63 = vsub.f32 %v1657_v59, %v1658_v60 }
 0x200   : > { %4322 = vmatpush3.msra.mxu1 %v4834_v21  ;;  %4325 = vmatprep.mubr.msk.f32.mxu1 %vm4646_vm0, %v4645_v0 }
 0x201   : > { %4323 = vmatprep.subr.mxu1 %v4645_v0  ;;  %v1660_v1 = vand.u32 4294901760, %v1659_v63 }
 0x202   : > { %4324 = vmatpush3.msra.mxu1 %v4842_v24 }
 0x203   : > { %4291 = vmatmul.mubr.f32.vlgmr.msra.gmra.mxu0 %v1660_v1  ;;  %4326 = vmatmul.mubr.f32.vlgmr.msra.gmra.mxu1 %v1656_v56 }
 0x204   : > { %4301 = vmatpush3.msra.mxu0 %v4840_v23  ;;  %4304 = vmatprep.mubr.msk.f32.mxu0 %vm4646_vm0, %v4645_v0 }
 0x205   : > { %4302 = vmatprep.subr.mxu0 %v4645_v0  ;;  %4335 = vmatprep.subr.mxu1 %v4645_v0 }
 0x206   : > { %4303 = vmatpush3.msra.mxu0 %v4850_v26  ;;  %4336 = vmatpush3.msra.mxu1 %v2163_v2 }
 0x207   : > { %4305 = vmatmul.mubr.f32.vlgmr.msra.gmra.mxu0 %v1657_v59  ;;  %4314 = vmatprep.subr.mxu0 %v4645_v0  ;;  %v5070_v59 = vsub.f32 %v4005_v48, %v5065_v54 }
 0x208   : > { %4315 = vmatpush3.msra.mxu0 %v4847_v25  ;;  %4318 = vmatprep.mubr.msk.f32.mxu0 %vm4646_vm0, %v4645_v0 }
 0x209   : > { %4316 = vmatprep.subr.mxu0 %v4645_v0  ;;  %4337 = vmatprep.subr.mxu1 %v4645_v0  ;;  %v3094_v63 = vand.u32 4294901760, %v5070_v59 }
 0x20a   : > { %4317 = vmatpush3.msra.mxu0 %v4857_v28  ;;  %4338 = vmatpush3.msra.mxu1 %v2170_v4 }
 0x20b   : > { %4319 = vmatmul.mubr.f32.vlgmr.msra.gmra.mxu0 %v1656_v56  ;;  %4328 = vmatprep.subr.mxu0 %v4645_v0  ;;  %v3095_v4 = vsub.f32 %v5070_v59, %v3094_v63 }
 0x20c   : > { %4329 = vmatpush3.msra.mxu0 %v4966_v45  ;;  %4332 = vmatprep.mubr.msk.f32.mxu0 %vm4646_vm0, %v4645_v0 }
 0x20d   : > { %4330 = vmatprep.subr.mxu0 %v4645_v0  ;;  %4339 = vmatprep.mubr.msk.f32.mxu1 %vm4646_vm0, %v4645_v0 }
 0x20e   : > { %4331 = vmatpush3.msra.mxu0 %v4972_v53  ;;  %4340 = vmatmul.mubr.f32.vlgmr.msra.gmra.mxu1 %v4789_v7 }
 0x20f   : > { %4333 = vmatmul.mubr.f32.vlgmr.msra.gmra.mxu0 %v4801_v19  ;;  %4342 = vmatprep.subr.mxu0 %v4645_v0 }
 0x210   : > { %4343 = vmatpush3.msra.mxu0 %v4970_v52  ;;  %4349 = vmatprep.subr.mxu1 %v4645_v0 }
 0x211   : > { %4344 = vmatprep.subr.mxu0 %v4645_v0  ;;  %4350 = vmatpush3.msra.mxu1 %v4966_v45 }
 0x212   : > { %4345 = vmatpush3.msra.mxu0 %v4977_v58  ;;  %4346 = vmatprep.mubr.msk.f32.mxu0 %vm4646_vm0, %v4645_v0 }
 0x213   : > { %4351 = vmatprep.subr.mxu1 %v4645_v0  ;;  %4347 = vmatmul.mubr.f32.vlgmr.msra.gmra.mxu0 %v4793_v10 }
 0x214   : > { %4352 = vmatpush3.msra.mxu1 %v4972_v53  ;;  %4353 = vmatprep.mubr.msk.f32.mxu1 %vm4646_vm0, %v4645_v0 }
 0x215   : > { %4356 = vmatprep.subr.mxu0 %v4645_v0  ;;  %4354 = vmatmul.mubr.f32.vlgmr.msra.gmra.mxu1 %v4796_v13 }
 0x216   : > { %4357 = vmatpush3.msra.mxu0 %v2161_v57  ;;  %4363 = vmatprep.subr.mxu1 %v4645_v0 }
 0x217   : > { %4358 = vmatprep.subr.mxu0 %v4645_v0  ;;  %4364 = vmatpush3.msra.mxu1 %v4966_v45 }
 0x218   : > { %4359 = vmatpush3.msra.mxu0 %v2168_v62  ;;  %4360 = vmatprep.mubr.msk.f32.mxu0 %vm4646_vm0, %v4645_v0 }
 0x219   : > { %4365 = vmatprep.subr.mxu1 %v4645_v0  ;;  %4361 = vmatmul.mubr.f32.vlgmr.msra.gmra.mxu0 %v4789_v7 }
 0x21a   : > { %4366 = vmatpush3.msra.mxu1 %v4972_v53  ;;  %4367 = vmatprep.mubr.msk.f32.mxu1 %vm4646_vm0, %v4645_v0  ;;  %v5063_v53 = vsub.f32 %v4006_v43, %v5059_v46 }
 0x21b   : > { %4368 = vmatmul.mubr.f32.vlgmr.msra.gmra.mxu1 %v4789_v7  ;;  %4377 = vmatprep.subr.mxu1 %v4645_v0 }
 0x21c   : > { %4378 = vmatpush3.msra.mxu1 %v4859_v29  ;;  %4381 = vmatprep.mubr.msk.f32.mxu1 %vm4646_vm0, %v4645_v0  ;;  %v3087_v58 = vand.u32 4294901760, %v5063_v53 }
 0x21d   : > { %4379 = vmatprep.subr.mxu1 %v4645_v0  ;;  %4370 = vmatprep.subr.mxu0 %v4645_v0 }
 0x21e   : > { %4380 = vmatpush3.msra.mxu1 %v4864_v31  ;;  %4371 = vmatpush3.msra.mxu0 %v4834_v21  ;;  %v3088_v62 = vsub.f32 %v5063_v53, %v3087_v58 }
 0x21f   : > { %4391 = vmatprep.subr.mxu1 %v4645_v0  ;;  %4372 = vmatprep.subr.mxu0 %v4645_v0 }
 0x220   : > { %4373 = vmatpush3.msra.mxu0 %v4842_v24  ;;  %4374 = vmatprep.mubr.msk.f32.mxu0 %vm4646_vm0, %v4645_v0  ;;  %v3089_v3 = vand.u32 4294901760, %v3088_v62 }
 0x221   : > { %4384 = vmatprep.subr.mxu0 %v4645_v0 }
 0x2bb   : > { %v1743_v5 = vpop.f32.mrf.mxu1 }
 0x2bd   : > { %v4299_v6 = vpop.f32.mrf.mxu1 }
 0x2bf   : > { %v1894_v8 = vpop.f32.mrf.mxu1 }
 0x2c1   : > { %v4313_v9 = vpop.f32.mrf.mxu1 }
 0x2c3   : > { %v1662_v11 = vpop.f32.mrf.mxu0  ;;  %v2044_v12 = vpop.f32.mrf.mxu1 }
 0x2c4   : > { %v1744_v16 = vadd.f32 %v1743_v5, %v1662_v11  ;;  %v3096_v5 = vand.u32 4294901760, %v3095_v4 }
 0x2c5   : > { %v4292_v14 = vpop.f32.mrf.mxu0  ;;  %v4327_v15 = vpop.f32.mrf.mxu1 }
 0x2c7   : > { %v1819_v17 = vpop.f32.mrf.mxu0 }
 0x2c8   : > { %v1820_v18 = vadd.f32 %v1819_v17, %v1744_v16 }
 0x2c9   : > { %v4306_v20 = vpop.f32.mrf.mxu0 }
 0x2ca   : > { %v1895_v22 = vadd.f32 %v1894_v8, %v1820_v18 }
 0x2cb   : > { %v1971_v27 = vpop.f32.mrf.mxu0 }
 0x2cc   : > { %v1972_v30 = vadd.f32 %v1971_v27, %v1895_v22 }
 0x2cd   : > { %v4320_v32 = vpop.f32.mrf.mxu0 }
 0x2ce   : > { %v2045_v33 = vadd.f32 %v2044_v12, %v1972_v30  ;;  %v2207_v34 = vpop.f32.mrf.mxu1 }
 0x2cf   : > { %v2126_v35 = vpop.f32.mrf.mxu0 }
 0x2d0   : > { %4001 = vst.msk [vmem:[%s4961_s20 + $0x8] sm:$0xff] %vm1122_vm2, %v2045_v33  ;;  %v4341_v36 = vpop.f32.mrf.mxu1  ;;  %v2208_v38 = vadd.f32 %v2207_v34, %v2126_v35 }
 0x2d1   : > { %v4334_v37 = vpop.f32.mrf.mxu0 }
 0x2d3   : > { %v2283_v39 = vpop.f32.mrf.mxu0 }
 0x2d4   : > { %v2284_v40 = vadd.f32 %v2283_v39, %v2208_v38 }
 0x2d5   : > { %v2358_v41 = vpop.f32.mrf.mxu1  ;;  %v4348_v42 = vpop.f32.mrf.mxu0 }
 0x2d6   : > { %v2359_v44 = vadd.f32 %v2358_v41, %v2284_v40 }
 0x2d7   : > { %v4355_v45 = vpop.f32.mrf.mxu1 }
 0x2d9   : > { %v2435_v47 = vpop.f32.mrf.mxu0 }
 0x2da   : > { %v2436_v49 = vadd.f32 %v2435_v47, %v2359_v44 }
 0x2db   : > { %v2508_v50 = vpop.f32.mrf.mxu1  ;;  %v4362_v51 = vpop.f32.mrf.mxu0 }
 0x2dc   : > { %v2509_v52 = vadd.f32 %v2508_v50, %v2436_v49 }
 0x2dd   : > { %v4369_v55 = vpop.f32.mrf.mxu1 }
 0x2de   : > { %v2513_v56 = vsel %vm197_vm1, %v2509_v52, 0 }
 0x2df   : > { %v2582_v57 = vand.u32 4294901760, %v2513_v56 }
 0x2e1   : > { %v2583_v60 = vsub.f32 %v2513_v56, %v2582_v57  ;;  %4382 = vmatmul.mubr.f32.vlgmr.msra.gmra.mxu1 %v2582_v57 }
 0x2e2   : > { %4392 = vmatpush3.msra.mxu1 %v4834_v21  ;;  %4395 = vmatprep.mubr.msk.f32.mxu1 %vm4646_vm0, %v4645_v0 }
 0x2e3   : > { %4393 = vmatprep.subr.mxu1 %v4645_v0  ;;  %v2584_v61 = vand.u32 4294901760, %v2583_v60 }
 0x2e4   : > { %4394 = vmatpush3.msra.mxu1 %v4842_v24 }
 0x2e5   : > { %4396 = vmatmul.mubr.f32.vlgmr.msra.gmra.mxu1 %v2584_v61  ;;  %4405 = vmatprep.subr.mxu1 %v4645_v0  ;;  %v2585_v1 = vsub.f32 %v2583_v60, %v2584_v61 }
 0x2e6   : > { %4406 = vmatpush3.msra.mxu1 %v4834_v21  ;;  %4409 = vmatprep.mubr.msk.f32.mxu1 %vm4646_vm0, %v4645_v0 }
 0x2e7   : > { %4407 = vmatprep.subr.mxu1 %v4645_v0  ;;  %v2586_v2 = vand.u32 4294901760, %v2585_v1 }
 0x2e8   : > { %4408 = vmatpush3.msra.mxu1 %v4842_v24 }
 0x2e9   : > { %4375 = vmatmul.mubr.f32.vlgmr.msra.gmra.mxu0 %v2586_v2  ;;  %4410 = vmatmul.mubr.f32.vlgmr.msra.gmra.mxu1 %v2582_v57 }
 0x2ea   : > { %4385 = vmatpush3.msra.mxu0 %v4840_v23  ;;  %4388 = vmatprep.mubr.msk.f32.mxu0 %vm4646_vm0, %v4645_v0 }
 0x2eb   : > { %4386 = vmatprep.subr.mxu0 %v4645_v0  ;;  %4419 = vmatprep.subr.mxu1 %v4645_v0 }
 0x2ec   : > { %4387 = vmatpush3.msra.mxu0 %v4850_v26  ;;  %4420 = vmatpush3.msra.mxu1 %v3089_v3 }
 0x2ed   : > { %4389 = vmatmul.mubr.f32.vlgmr.msra.gmra.mxu0 %v2583_v60  ;;  %4398 = vmatprep.subr.mxu0 %v4645_v0 }
 0x2ee   : > { %4399 = vmatpush3.msra.mxu0 %v4847_v25  ;;  %4402 = vmatprep.mubr.msk.f32.mxu0 %vm4646_vm0, %v4645_v0 }
 0x2ef   : > { %4400 = vmatprep.subr.mxu0 %v4645_v0  ;;  %4421 = vmatprep.subr.mxu1 %v4645_v0 }
 0x2f0   : > { %4401 = vmatpush3.msra.mxu0 %v4857_v28  ;;  %4422 = vmatpush3.msra.mxu1 %v3096_v5 }
 0x2f1   : > { %4403 = vmatmul.mubr.f32.vlgmr.msra.gmra.mxu0 %v2582_v57  ;;  %4412 = vmatprep.subr.mxu0 %v4645_v0 }
 0x2f2   : > { %4413 = vmatpush3.msra.mxu0 %v5059_v46  ;;  %4416 = vmatprep.mubr.msk.f32.mxu0 %vm4646_vm0, %v4645_v0 }
 0x2f3   : > { %4414 = vmatprep.subr.mxu0 %v4645_v0  ;;  %4423 = vmatprep.mubr.msk.f32.mxu1 %vm4646_vm0, %v4645_v0 }
 0x2f4   : > { %4415 = vmatpush3.msra.mxu0 %v5065_v54  ;;  %4424 = vmatmul.mubr.f32.vlgmr.msra.gmra.mxu1 %v4789_v7 }
 0x2f5   : > { %4417 = vmatmul.mubr.f32.vlgmr.msra.gmra.mxu0 %v4801_v19  ;;  %4426 = vmatprep.subr.mxu0 %v4645_v0 }
 0x2f6   : > { %4427 = vmatpush3.msra.mxu0 %v5063_v53  ;;  %4433 = vmatprep.subr.mxu1 %v4645_v0 }
 0x2f7   : > { %4428 = vmatprep.subr.mxu0 %v4645_v0  ;;  %4434 = vmatpush3.msra.mxu1 %v5059_v46 }
 0x2f8   : > { %4429 = vmatpush3.msra.mxu0 %v5070_v59  ;;  %4430 = vmatprep.mubr.msk.f32.mxu0 %vm4646_vm0, %v4645_v0 }
 0x2f9   : > { %4435 = vmatprep.subr.mxu1 %v4645_v0  ;;  %4431 = vmatmul.mubr.f32.vlgmr.msra.gmra.mxu0 %v4793_v10 }
 0x2fa   : > { %4436 = vmatpush3.msra.mxu1 %v5065_v54  ;;  %4437 = vmatprep.mubr.msk.f32.mxu1 %vm4646_vm0, %v4645_v0 }
 0x2fb   : > { %4440 = vmatprep.subr.mxu0 %v4645_v0  ;;  %4438 = vmatmul.mubr.f32.vlgmr.msra.gmra.mxu1 %v4796_v13 }
 0x2fc   : > { %4441 = vmatpush3.msra.mxu0 %v3087_v58  ;;  %4447 = vmatprep.subr.mxu1 %v4645_v0 }
 0x2fd   : > { %4442 = vmatprep.subr.mxu0 %v4645_v0  ;;  %4448 = vmatpush3.msra.mxu1 %v5059_v46 }
 0x2fe   : > { %4443 = vmatpush3.msra.mxu0 %v3094_v63  ;;  %4444 = vmatprep.mubr.msk.f32.mxu0 %vm4646_vm0, %v4645_v0 }
 0x2ff   : > { %4449 = vmatprep.subr.mxu1 %v4645_v0  ;;  %4445 = vmatmul.mubr.f32.vlgmr.msra.gmra.mxu0 %v4789_v7 }
 0x300   : > { %4450 = vmatpush3.msra.mxu1 %v5065_v54  ;;  %4451 = vmatprep.mubr.msk.f32.mxu1 %vm4646_vm0, %v4645_v0 }
 0x301   : > { %4452 = vmatmul.mubr.f32.vlgmr.msra.gmra.mxu1 %v4789_v7  ;;  %4461 = vmatprep.subr.mxu1 %v4645_v0 }
 0x302   : > { %4462 = vmatpush3.msra.mxu1 %v4859_v29  ;;  %4465 = vmatprep.mubr.msk.f32.mxu1 %vm4646_vm0, %v4645_v0 }
 0x303   : > { %4463 = vmatprep.subr.mxu1 %v4645_v0  ;;  %4454 = vmatprep.subr.mxu0 %v4645_v0 }
 0x304   : > { %4464 = vmatpush3.msra.mxu1 %v4864_v31  ;;  %4455 = vmatpush3.msra.mxu0 %v4834_v21 }
 0x305   : > { %4475 = vmatprep.subr.mxu1 %v4645_v0  ;;  %4456 = vmatprep.subr.mxu0 %v4645_v0 }
 0x306   : > { %4457 = vmatpush3.msra.mxu0 %v4842_v24  ;;  %4458 = vmatprep.mubr.msk.f32.mxu0 %vm4646_vm0, %v4645_v0 }
 0x307   : > { %4468 = vmatprep.subr.mxu0 %v4645_v0 }
 0x3a1   : > { %v2669_v7 = vpop.f32.mrf.mxu1 }
 0x3a3   : > { %v4383_v10 = vpop.f32.mrf.mxu1 }
 0x3a5   : > { %v2820_v13 = vpop.f32.mrf.mxu1 }
 0x3a7   : > { %v4397_v19 = vpop.f32.mrf.mxu1 }
 0x3a9   : > { %v2588_v29 = vpop.f32.mrf.mxu0  ;;  %v2970_v31 = vpop.f32.mrf.mxu1 }
 0x3aa   : > { %v2670_v9 = vadd.f32 %v2669_v7, %v2588_v29 }
 0x3ab   : > { %v4376_v6 = vpop.f32.mrf.mxu0  ;;  %v4411_v8 = vpop.f32.mrf.mxu1 }
 0x3ad   : > { %v2745_v11 = vpop.f32.mrf.mxu0 }
 0x3ae   : > { %v2746_v12 = vadd.f32 %v2745_v11, %v2670_v9 }
 0x3af   : > { %v4390_v14 = vpop.f32.mrf.mxu0 }
 0x3b0   : > { %v2821_v15 = vadd.f32 %v2820_v13, %v2746_v12 }
 0x3b1   : > { %v2897_v16 = vpop.f32.mrf.mxu0 }
 0x3b2   : > { %v2898_v17 = vadd.f32 %v2897_v16, %v2821_v15 }
 0x3b3   : > { %v4404_v18 = vpop.f32.mrf.mxu0 }
 0x3b4   : > { %v2971_v20 = vadd.f32 %v2970_v31, %v2898_v17  ;;  %v3133_v22 = vpop.f32.mrf.mxu1 }
 0x3b5   : > { %v3052_v27 = vpop.f32.mrf.mxu0 }
 0x3b6   : > { %4004 = vst.msk [vmem:[%s4961_s20 + $0x10] sm:$0xff] %vm1122_vm2, %v2971_v20  ;;  %v4425_v30 = vpop.f32.mrf.mxu1  ;;  %v3134_v33 = vadd.f32 %v3133_v22, %v3052_v27 }
 0x3b7   : > { %v4418_v32 = vpop.f32.mrf.mxu0 }
 0x3b9   : > { %v3209_v34 = vpop.f32.mrf.mxu0 }
 0x3ba   : > { %v3210_v35 = vadd.f32 %v3209_v34, %v3134_v33 }
 0x3bb   : > { %v3284_v36 = vpop.f32.mrf.mxu1  ;;  %v4432_v37 = vpop.f32.mrf.mxu0 }
 0x3bc   : > { %v3285_v38 = vadd.f32 %v3284_v36, %v3210_v35 }
 0x3bd   : > { %v4439_v39 = vpop.f32.mrf.mxu1 }
 0x3bf   : > { %v3361_v40 = vpop.f32.mrf.mxu0 }
 0x3c0   : > { %v3362_v41 = vadd.f32 %v3361_v40, %v3285_v38 }
 0x3c1   : > { %v3434_v42 = vpop.f32.mrf.mxu1  ;;  %v4446_v43 = vpop.f32.mrf.mxu0 }
 0x3c2   : > { %v3435_v44 = vadd.f32 %v3434_v42, %v3362_v41 }
 0x3c3   : > { %v4453_v45 = vpop.f32.mrf.mxu1 }
 0x3c4   : > { %v3439_v46 = vsel %vm197_vm1, %v3435_v44, 0 }
 0x3c5   : > { %v3508_v47 = vand.u32 4294901760, %v3439_v46 }
 0x3c7   : > { %v3509_v48 = vsub.f32 %v3439_v46, %v3508_v47  ;;  %4466 = vmatmul.mubr.f32.vlgmr.msra.gmra.mxu1 %v3508_v47 }
 0x3c8   : > { %4476 = vmatpush3.msra.mxu1 %v4834_v21  ;;  %4479 = vmatprep.mubr.msk.f32.mxu1 %vm4646_vm0, %v4645_v0 }
 0x3c9   : > { %4477 = vmatprep.subr.mxu1 %v4645_v0  ;;  %v3510_v49 = vand.u32 4294901760, %v3509_v48 }
 0x3ca   : > { %4478 = vmatpush3.msra.mxu1 %v4842_v24 }
 0x3cb   : > { %4480 = vmatmul.mubr.f32.vlgmr.msra.gmra.mxu1 %v3510_v49  ;;  %4489 = vmatprep.subr.mxu1 %v4645_v0  ;;  %v3511_v50 = vsub.f32 %v3509_v48, %v3510_v49 }
 0x3cc   : > { %4490 = vmatpush3.msra.mxu1 %v4834_v21  ;;  %4493 = vmatprep.mubr.msk.f32.mxu1 %vm4646_vm0, %v4645_v0 }
 0x3cd   : > { %4491 = vmatprep.subr.mxu1 %v4645_v0  ;;  %v3512_v51 = vand.u32 4294901760, %v3511_v50 }
 0x3ce   : > { %4492 = vmatpush3.msra.mxu1 %v4842_v24 }
 0x3cf   : > { %4459 = vmatmul.mubr.f32.vlgmr.msra.gmra.mxu0 %v3512_v51  ;;  %4494 = vmatmul.mubr.f32.vlgmr.msra.gmra.mxu1 %v3508_v47 }
 0x3d0   : > { %4469 = vmatpush3.msra.mxu0 %v4840_v23  ;;  %4472 = vmatprep.mubr.msk.f32.mxu0 %vm4646_vm0, %v4645_v0 }
 0x3d1   : > { %4470 = vmatprep.subr.mxu0 %v4645_v0 }
 0x3d2   : > { %4471 = vmatpush3.msra.mxu0 %v4850_v26 }
 0x3d3   : > { %4473 = vmatmul.mubr.f32.vlgmr.msra.gmra.mxu0 %v3509_v48  ;;  %4482 = vmatprep.subr.mxu0 %v4645_v0 }
 0x3d4   : > { %4483 = vmatpush3.msra.mxu0 %v4847_v25  ;;  %4486 = vmatprep.mubr.msk.f32.mxu0 %vm4646_vm0, %v4645_v0 }
 0x3d5   : > { %4484 = vmatprep.subr.mxu0 %v4645_v0 }
 0x3d6   : > { %4485 = vmatpush3.msra.mxu0 %v4857_v28 }
 0x3d7   : > { %4487 = vmatmul.mubr.f32.vlgmr.msra.gmra.mxu0 %v3508_v47 }
 0x487   : > { %v3595_v21 = vpop.f32.mrf.mxu1 }
 0x489   : > { %v4467_v23 = vpop.f32.mrf.mxu1 }
 0x48b   : > { %v3746_v24 = vpop.f32.mrf.mxu1 }
 0x48d   : > { %v4481_v52 = vpop.f32.mrf.mxu1 }
 0x48f   : > { %v3514_v26 = vpop.f32.mrf.mxu0  ;;  %v3896_v53 = vpop.f32.mrf.mxu1 }
 0x490   : > { %v3596_v55 = vadd.f32 %v3595_v21, %v3514_v26 }
 0x491   : > { %v4460_v54 = vpop.f32.mrf.mxu0  ;;  %v4495_v25 = vpop.f32.mrf.mxu1 }
 0x493   : > { %v3671_v56 = vpop.f32.mrf.mxu0 }
 0x494   : > { %v3672_v57 = vadd.f32 %v3671_v56, %v3596_v55 }
 0x495   : > { %v4474_v0 = vpop.f32.mrf.mxu0 }
 0x496   : > { %v3747_v58 = vadd.f32 %v3746_v24, %v3672_v57 }
 0x497   : > { %v3823_v28 = vpop.f32.mrf.mxu0 }
 0x498   : > { %v3824_v59 = vadd.f32 %v3823_v28, %v3747_v58 }
 0x499   : > { %v4488_v60 = vpop.f32.mrf.mxu0 }
 0x49a   : > { %v3897_v61 = vadd.f32 %v3896_v53, %v3824_v59 }
 0x49c   : > { %4007 = vst.msk [vmem:[%s4961_s20 + $0x18] sm:$0xff] %vm1122_vm2, %v3897_v61 }
 0x49d   : > { %4589 = shalt.err (!%p4586_p10)
}
 0x49e   : > { %s4590_s4 = scalar_lea.hbm %s5181_s29, 512  ;;  %s4594_s7 = scalar_lea.hbm %s5229_s3, 1024 }
 0x49f   : > { %p4591_p0 = scmp.ne.s32.totalorder %s5181_s29, %s4590_s4  ;;  %p4595_p1 = scmp.lt.s32.totalorder %s5181_s29, %s5229_s3 }
 0x4a0   : > { %p4596_p3 = scmp.lt.s32.totalorder %s4594_s7, %s4590_s4 }
 0x4a1   : > { %p4592_p2 = pnand %p4591_p0, %p5238_p12 }
 0x4a2   : > { %p4597_p6 = por %p4596_p3, %p4595_p1 }
 0x4a3   : > { %p4593_p9 = pneg %p4592_p2 }
 0x4a5   : > { %p4598_p11 = pnand %p4597_p6, %p4593_p9 }
 0x4a7   : > { %4601 = shalt.err (!%p4598_p11)
}
 0x4a8   : > { %s4648_s19 = smov 128   ;;  %s4649_s20 = smov 8  }
 0x4a9   : > { %4498 = dma.vmem_to_hbm [thread:$0]  (%p5238_p12), %s5176_s22, 512, %s5181_s29, %s3903_s30, %s4648_s19, %s4648_s19, %s4649_s20  }
 0x4aa PF: > { %s3931_s26 = sand.u32 1, %s4628_s12   ;;  %p5239_p13 = scmp.ne.s32.totalorder %s5235_s25, 0 }
 0x4ab   : > { %p5240_p4 = scmp.ge.s32.totalorder %s4640_s15, 2  ;;  %s3932_s27 = scalar_lea.sflag [#allocation4], %s3931_s26 }
 0x4ad   : > { %p4505_p5 = pnand %p5240_p4, %p5239_p13 }
 0x4af   : > { %p4506_p7 = pneg %p4505_p5 }
 0x4b1   : > { %4623 = dma.done.wait (%p4506_p7), %s3932_s27, 512  }
 0x4b2   : > { %4625 = vsyncadd (%p4506_p7), %s3932_s27, 4294966784  ;;  %p16_p8 = scmp.ge.s32.totalorder %s4695_s18, 4   ;;  %s5241_s12 = smov %s4632_s13 }
 0x4b3   : > { %s5242_s13 = smov %s4636_s14  ;;  %s5243_s14 = smov %s4707_s21 }
 0x4b4   : > { %s5244_s15 = smov %s4695_s18  ;;  %18 = sbr.rel (!%p16_p8) target bundleno = 5 (0x5), region = 83 }
 0x4b9   :  { %3937 = vsyncpa [#allocation3], 1 }
 0x4ba   :  { %3939 = vsyncpa [#allocation3 + $0x1], 1 }
 0x4bb   :  { %3940 = vsyncpa [#allocation4], 1 }
 0x4bc   :  { %3942 = vsyncpa [#allocation4 + $0x1], 1 }

</bundles_post_ra>
